<compile_context>
chip_gen: v7x
topology: tpu7x:2x2x1
jax: 0.10.0
libtpu: 0.0.40
codegen_flags: <defaults>
</compile_context>

<pallas_src>
import jax
import jax.numpy as jnp
from jax.experimental import pallas as pl
from jax.experimental.pallas import tpu as pltpu

_LANE = 128
_SUBLANE = 8
# ~2 MiB per tile: double-buffered in+out ~= 8 MiB -> safe under v5e's 16 MiB
# scoped-VMEM default, ~85% of HBM roofline on v6e, reasonable on v7x.
_TARGET_TILE_BYTES = 2 << 20


def _affine_kernel(x_ref, a_ref, b_ref, o_ref):
    # x_ref / o_ref: (TR, TL) tile.  a_ref / b_ref: (TR, 1) f32 per-row
    # constants, broadcast across the lane axis.  out = x*(1/scale) - shift/scale.
    x = x_ref[...].astype(jnp.float32)
    o_ref[...] = (x * a_ref[...] + b_ref[...]).astype(o_ref.dtype)


def _round_down(x, q):
    return (x // q) * q


def _choose_layout(R, L):
    """Pick a lane width L2 (multiple of 128 dividing L) and chunk count
    `reps = L // L2` so the 2-D slab (R*reps, L2) has at least 8 rows.
    For R >= 8 the plain (R, L) layout is already sublane-full."""
    if R >= _SUBLANE:
        return L, 1
    fallback = None
    for lc in (4096, 2048, 1024, 512, 256, _LANE):
        if lc <= L and L % lc == 0:
            reps = L // lc
            if R * reps >= _SUBLANE:
                return lc, reps
            if fallback is None:
                fallback = (lc, reps)
    if fallback is not None:
        return fallback
    # L has no multiple-of-128 divisor; fall back to (R, L) (masked stores).
    return L, 1


def _pick_tiles(R2, L2, itemsize, budget=_TARGET_TILE_BYTES):
    """Byte-budgeted (tr, tl) obeying the (8, 128) rule (or full-dim blocks)."""
    # Lane tile: full width if an 8-row slab fits the budget, else trim to a
    # multiple of 128 sized by the budget.
    if L2 <= _LANE or L2 * _SUBLANE * itemsize <= budget:
        tl = L2
    else:
        tl = min(L2, max(_LANE, _round_down(budget // (_SUBLANE * itemsize), _LANE)))
    # Row tile: fill the remaining budget with rows (multiple of 8), capped at R2.
    max_rows = max(_SUBLANE, _round_down(budget // (tl * itemsize), _SUBLANE))
    tr = min(R2, max_rows)
    # Guarantee >= 2 grid tiles when the slab allows it, so v7x can shard the
    # grid across its 2 TensorCores and the DMA pipeline has steps to overlap.
    if tr == R2 and tl == L2 and R2 >= 2 * _SUBLANE:
        tr = max(_SUBLANE, _round_down((R2 + 1) // 2, _SUBLANE))
    return tr, tl


def scaling_layer(x, shift, scale):
    """x: (N, C, H, W); shift/scale: (1, C, 1, 1) float32. Returns (x-shift)/scale."""
    N, C, H, W = x.shape
    R = N * C          # row axis (sublane side)
    L = H * W          # lane axis

    # Fold (x - shift) / scale  ->  x * a + b  (f32 constants, tiny wrapper cost).
    inv_scale = (1.0 / scale.reshape(C)).astype(jnp.float32)
    bias = (-shift.reshape(C)).astype(jnp.float32) * inv_scale
    a_per_row = jnp.tile(inv_scale, N)              # row r -> channel r % C
    b_per_row = jnp.tile(bias, N)

    # Layout: fold lane chunks into the sublane axis when R < 8.
    L2, reps = _choose_layout(R, L)
    R2 = R * reps
    x2d = x.reshape(R2, L2)                         # contiguous, free reshape
    a_rows = jnp.repeat(a_per_row, reps).reshape(R2, 1)
    b_rows = jnp.repeat(b_per_row, reps).reshape(R2, 1)

    itemsize = jnp.dtype(x.dtype).itemsize
    tr, tl = _pick_tiles(R2, L2, itemsize)
    grid = (pl.cdiv(R2, tr), pl.cdiv(L2, tl))

    y2d = pl.pallas_call(
        _affine_kernel,
        out_shape=jax.ShapeDtypeStruct((R2, L2), x.dtype),
        grid_spec=pltpu.PrefetchScalarGridSpec(
            num_scalar_prefetch=0,
            grid=grid,
            in_specs=[
                pl.BlockSpec((tr, tl), lambda r, l: (r, l)),
                # a/b block index depends only on the row tile -> not re-DMA'd
                # while the inner (lane) grid axis advances.
                pl.BlockSpec((tr, 1), lambda r, l: (r, 0)),
                pl.BlockSpec((tr, 1), lambda r, l: (r, 0)),
            ],
            out_specs=pl.BlockSpec((tr, tl), lambda r, l: (r, l)),
        ),
        compiler_params=pltpu.CompilerParams(
            dimension_semantics=("parallel", "parallel"),
        ),
    )(x2d, a_rows, b_rows)

    return y2d.reshape(N, C, H, W)


if __name__ == "__main__":
    # Deterministic buffers, exactly as in the PyTorch module's __init__.
    shift = jnp.array([-0.030, -0.088, -0.188], dtype=jnp.float32)[None, :, None, None]
    scale = jnp.array([0.458, 0.448, 0.450], dtype=jnp.float32)[None, :, None, None]

    key = jax.random.PRNGKey(0)
    # Small shapes consistent with the 3-channel buffers; the three cases
    # exercise the folded tiny-row layout (N*C < 8) and the plain R >= 8 path.
    shapes = [(2, 3, 16, 16), (2, 3, 64, 64), (4, 3, 32, 32)]
    for i, shp in enumerate(shapes):
        x = jax.random.normal(jax.random.fold_in(key, i), shp, dtype=jnp.float32)
        out = jax.block_until_ready(scaling_layer(x, shift, scale))
        ref = (x - shift) / scale   # mirrors the PyTorch forward
        assert out.shape == x.shape
        assert jnp.allclose(out, ref, atol=1e-5, rtol=1e-5), shp

    print("KERNEL_OK")
</pallas_src>

<mosaic_0001>
module attributes {stable_mosaic.version = 11 : i64} {
  func.func @_affine_kernel(%arg0: i32, %arg1: i32, %arg2: memref<12x128xf32, #tpu.memory_space<vmem>>, %arg3: memref<12x1xf32, #tpu.memory_space<vmem>>, %arg4: memref<12x1xf32, #tpu.memory_space<vmem>>, %arg5: memref<12x128xf32, #tpu.memory_space<vmem>>) attributes {dimension_semantics = [#tpu.dimension_semantics<parallel>, #tpu.dimension_semantics<parallel>], iteration_bounds = array<i64: 1, 1>, scalar_prefetch = 0 : i64, scratch_operands = 0 : i64, tpu.core_type = #tpu.core_type<tc>, window_params = [{transform_indices = @transform_0, window_bounds = array<i64: 12, 128>}, {transform_indices = @transform_1, window_bounds = array<i64: 12, 1>}, {transform_indices = @transform_2, window_bounds = array<i64: 12, 1>}, {transform_indices = @transform_3, window_bounds = array<i64: 12, 128>}]} {
    %c0 = arith.constant 0 : index
    %c0_0 = arith.constant 0 : index
    %0 = vector.load %arg2[%c0, %c0_0] : memref<12x128xf32, #tpu.memory_space<vmem>>, vector<12x128xf32>
    %c0_1 = arith.constant 0 : index
    %c0_2 = arith.constant 0 : index
    %1 = vector.load %arg3[%c0_1, %c0_2] : memref<12x1xf32, #tpu.memory_space<vmem>>, vector<12x1xf32>
    %2 = vector.broadcast %1 : vector<12x1xf32> to vector<12x128xf32>
    %3 = arith.mulf %0, %2 : vector<12x128xf32>
    %c0_3 = arith.constant 0 : index
    %c0_4 = arith.constant 0 : index
    %4 = vector.load %arg4[%c0_3, %c0_4] : memref<12x1xf32, #tpu.memory_space<vmem>>, vector<12x1xf32>
    %5 = vector.broadcast %4 : vector<12x1xf32> to vector<12x128xf32>
    %6 = arith.addf %3, %5 : vector<12x128xf32>
    %c0_5 = arith.constant 0 : index
    %c0_6 = arith.constant 0 : index
    %7 = vector.load %arg5[%c0_5, %c0_6] : memref<12x128xf32, #tpu.memory_space<vmem>>, vector<12x128xf32>
    tpu.vector_store %arg5[%c0_5, %c0_6], %6 {strides = array<i32>} : memref<12x128xf32, #tpu.memory_space<vmem>>, vector<12x128xf32>,
    return
  }
  func.func @transform_0(%arg0: i32, %arg1: i32) -> (i32, i32) {
    %c0_i32 = arith.constant 0 : i32
    return %arg0, %arg1 : i32, i32
  }
  func.func @transform_1(%arg0: i32, %arg1: i32) -> (i32, i32) {
    %c0_i32 = arith.constant 0 : i32
    %c0_i32_0 = arith.constant 0 : i32
    return %arg0, %c0_i32 : i32, i32
  }
  func.func @transform_2(%arg0: i32, %arg1: i32) -> (i32, i32) {
    %c0_i32 = arith.constant 0 : i32
    %c0_i32_0 = arith.constant 0 : i32
    return %arg0, %c0_i32 : i32, i32
  }
  func.func @transform_3(%arg0: i32, %arg1: i32) -> (i32, i32) {
    %c0_i32 = arith.constant 0 : i32
    return %arg0, %arg1 : i32, i32
  }
}

</mosaic_0001>

<bundles_post_ra>
// kernel: tpu_custom_call.1
= control target key start
LH: loop header
LB: loop body
LE: loop exit
PB: predicated region body
PF: predicated region fallthrough
CT: control target
= control target key end

     0   :  { %v93_v2 = vmov 0   ;;  %s147_s0 = inlined_call_operand.vmem [shape: f32[12,128], index: 0, kind: input, shape index: {}]   ;;  %s148_s1 = inlined_call_operand.vmem [shape: f32[12,1], index: 1, kind: input, shape index: {}]   ;;  %s149_s2 = inlined_call_operand.vmem [shape: f32[12,1], index: 2, kind: input, shape index: {}]   ;;  %s150_s3 = inlined_call_operand.hbm [shape: f32[12,128], index: 3, kind: output, shape index: {}]  }
   0x1   :  { %v31_v0 = vld [vmem:[%s149_s2] sm:$0xff]  ;;  %68 = vset.pattern.permute.xlu1 %v93_v2  ;;  %67 = vset.pattern.permute.xlu0 %v93_v2 }
   0x2   :  { %v17_v1 = vld [vmem:[%s148_s1] sm:$0xff] }
   0x3   :  { %8 = vsyncpa [#allocation3], 0  ;;  %35 = vperm.xlu1 %68, %v31_v0   ;;  %21 = vperm.xlu0 %67, %v17_v1   ;;  %v32_v3 = vld [vmem:[%s149_s2 + $0x8] sm:$0xf]  ;;  %v15_v5 = vld [vmem:[%s147_s0] sm:$0xff]  ;;  %s94_s24 = smov [#allocation2]  }
   0x4   :  { %v18_v4 = vld [vmem:[%s148_s1 + $0x8] sm:$0xf]  ;;  %s52_s2 = sshll.u32 %s94_s24, 4  ;;  %s53_s2 = int_to_ptr.vmem [resolvable:$true] %s52_s2 }
   0x5   :  { %v16_v9 = vld [vmem:[%s147_s0 + $0x8] sm:$0xf]  ;;  %s69_s1 = scalar_lea.vmem %s53_s2, 256  ;;  %p74_p1 = scmp.lt.s32.totalorder %s53_s2, %s53_s2 }
   0x6   :  { %p70_p0 = scmp.ne.s32.totalorder %s53_s2, %s69_s1  ;;  %p75_p2 = scmp.lt.s32.totalorder %s69_s1, %s69_s1 }
   0x7   :  { %40 = vperm.xlu1 %68, %v32_v3   ;;  %26 = vperm.xlu0 %67, %v18_v4  }
   0x8   :  { %p76_p3 = por %p75_p2, %p74_p1 }
   0xa   :  { %p77_p4 = pnand %p76_p3, %p70_p0 }
  0x82   :  { %v36_v6 = vpop.permute.xlu1 %35  ;;  %v22_v7 = vpop.permute.xlu0 %21 }
  0x83   :  { %v29_v8 = vmul.f32 %v22_v7, %v15_v5 }
  0x85   :  { %v43_v10 = vadd.f32 %v36_v6, %v29_v8 }
  0x86   :  { %v27_v11 = vpop.permute.xlu0 %26  ;;  %v41_v13 = vpop.permute.xlu1 %40 }
  0x87   :  { %45 = vst [vmem:[#allocation2] sm:$0xff] %v43_v10  ;;  %v30_v12 = vmul.f32 %v27_v11, %v16_v9 }
  0x89   :  { %v44_v14 = vadd.f32 %v41_v13, %v30_v12 }
  0x8b   :  { %46 = vst [vmem:[#allocation2 + $0x8] sm:$0xf] %v44_v14 }
  0x8c   :  { %80 = shalt.err (!%p77_p4)
}
  0x8d   :  { %s81_s0 = scalar_lea.hbm %s150_s3, 256 }
  0x8e   :  { %p82_p5 = scmp.ne.s32.totalorder %s150_s3, %s81_s0  ;;  %p85_p6 = scmp.lt.u32.totalorder %s81_s0, %s150_s3 }
  0x90   :  { %p87_p7 = pnand %p85_p6, %p82_p5 }
  0x92   :  { %90 = shalt.err (!%p87_p7)
}
  0x93   :  { %s95_s4 = smov 128   ;;  %s96_s5 = smov 8  }
  0x94   :  { %58 = dma.vmem_to_hbm [thread:$0]  %s53_s2, 256, %s150_s3, [#allocation3], %s95_s4, %s95_s4, %s96_s5  }
  0x95   :  { %91 = dma.done.wait [#allocation3], 256  }
  0x96   :  { %92 = vsyncadd [#allocation3], 4294967040 }
  0x97   :  { %62 = vsyncpa [#allocation3], 1 }

</bundles_post_ra>
